<compile_context>
chip_gen: v7x
topology: tpu7x:2x2x1
jax: 0.10.0
libtpu: 0.0.40
codegen_flags: <defaults>
</compile_context>

<pallas_src>
import functools

import jax
import jax.numpy as jnp
from jax import lax
from jax.experimental import pallas as pl
from jax.experimental.pallas import tpu as pltpu


def _round_up(v, m):
    return ((v + m - 1) // m) * m


def _resblock_kernel(x_ref, id_ref, w1_ref, w2_ref, pp_ref, o_ref, *,
                     N, L, K, pad, eps, mxu_dtype):
    NL = N * L
    inv_nl = 1.0 / float(NL)

    # Lane position within each batch segment; boundary masks built once and
    # shared by both convs (hoisted out of the tap loop — JAX does not CSE them).
    pos = lax.broadcasted_iota(jnp.int32, (1, NL), 1) % L
    masks = {}
    for k in range(K):
        d = k - pad
        if d != 0 and d not in masks:
            masks[d] = jnp.logical_and(pos + d >= 0, pos + d < L).astype(jnp.float32)

    def im2col(a):
        """Stack the K shifted (masked) taps along sublanes: (ca_p, NL) -> (K*ca_p, NL)."""
        cols = []
        for k in range(K):
            d = k - pad
            if d == 0:
                cols.append(a)                               # aligned tap, no mask
            else:
                cols.append(pltpu.roll(a, shift=(-d) % NL, axis=1) * masks[d])
        # ca_p is a multiple of 8, so this sublane concat is tile-aligned.
        return jnp.concatenate(cols, axis=0)

    def conv(a, w_ref_):
        """'same' 1-D conv as ONE MXU matmul: (Cout_p, K*ca_p) x (K*ca_p, NL), f32 acc."""
        return jnp.dot(w_ref_[...], im2col(a).astype(mxu_dtype),
                       preferred_element_type=jnp.float32)

    def bn(h, g, b, relu):
        """Batch-statistic BN with two-pass (centered) variance; folded scale/shift."""
        # TODO(synk): if the XLU saturates at large C, compute these reductions as a
        # [h ; h*h] x ones matmul on the (idle) MXU instead of two jnp.sum calls.
        m = jnp.sum(h, axis=1, keepdims=True) * inv_nl
        c = h - m
        v = jnp.sum(c * c, axis=1, keepdims=True) * inv_nl
        out = c * (g * lax.rsqrt(v + eps)) + b
        return jnp.maximum(out, 0.0) if relu else out

    x = x_ref[...]                                           # (Cin_p, NL) float32
    # conv1 -> bn1 -> relu   (conv bias absorbed exactly by the batch-stat BN mean)
    h1 = bn(conv(x, w1_ref), pp_ref[:, 0:1], pp_ref[:, 1:2], relu=True)
    # conv2 -> bn2
    h2 = bn(conv(h1, w2_ref), pp_ref[:, 2:3], pp_ref[:, 3:4], relu=False)
    # residual add (pre-tiled full-precision identity) -> bn3 -> relu,
    # written as one dense (C_p, NL) store.
    y = h2 + id_ref[...]
    o_ref[...] = bn(y, pp_ref[:, 4:5], pp_ref[:, 5:6], relu=True).astype(o_ref.dtype)


def resblock_forward(x, params, *, conv_kernel, conv_stride, conv_pad,
                     mxu_dtype=jnp.bfloat16):
    """Pallas TPU forward of ResBlock. x: (N, Cin, L) float32 -> (N, C, L) float32."""
    # TODO(synk): only stride == 1 with 'same' padding is implemented (as in the
    # example configs); other strides change the residual shape in the torch module.
    assert conv_stride == 1, "only stride=1 supported"
    w1, b1, g1, be1, w2, b2, g2, be2, g3, be3 = params
    del b1, b2  # conv biases cancel exactly against the batch-statistics BN mean
    N, Cin, L = x.shape
    C = w1.shape[0]
    K, pad = conv_kernel, conv_pad
    assert 2 * pad == K - 1, "residual add needs 'same' conv (output length == L)"
    if C == Cin:
        rep = 1
    elif C > Cin and C % Cin == 0:
        rep = C // Cin
    else:
        # (the Cin > C branch of the torch module feeds the wrong channel count
        # into self.bn and would error in torch as well)
        raise RuntimeError("Dims in ResBlock needs to be divisible on the previous dims!!")
    eps = 1e-5
    NL = N * L

    # Channel padding to multiples of 8 so all sublane concats / stores are aligned.
    Cin_p = _round_up(Cin, 8)
    C_p = _round_up(C, 8)

    # Per-generation VMEM budget (v5e/v6e: 128 MiB; v7x: 64 MiB per TensorCore).
    try:
        vmem_cap = int(pltpu.get_tpu_info().vmem_capacity_bytes)
    except Exception:  # conservative fallback
        vmem_cap = 64 * 1024 * 1024
    vmem_limit = min(vmem_cap // 2, 96 * 1024 * 1024)

    # Gridless, all-in-VMEM design — fine for small / medium activations.
    # TODO(synk): for large N*L, tile the lane axis with a grid, pipeline the DMAs,
    # and accumulate BN statistics across grid steps (two-phase finalize, pl.when).
    est_live_bytes = 4 * NL * (Cin_p + (2 * K + 6) * C_p)    # rough upper bound
    if est_live_bytes > (3 * vmem_limit) // 4:
        raise NotImplementedError("shape too large for the gridless ResBlock kernel")

    # Layout plumbing (wrapper-side XLA): channels -> sublanes, batch folded on lanes.
    x2d = x.astype(jnp.float32).transpose(1, 0, 2).reshape(Cin, NL)
    x2d_p = jnp.pad(x2d, ((0, Cin_p - Cin), (0, 0)))
    # Pre-tiled full-precision identity for the residual add (torch-style repeat).
    ident = jnp.tile(x2d, (rep, 1)) if rep > 1 else x2d
    ident_p = jnp.pad(ident, ((0, C_p - C), (0, 0)))

    # Conv weights (Cout, Cin, K) -> (Cout_p, K*Cin_p), row-major over (k, cin) so
    # the kernel's im2col row k*ca_p + ci multiplies w[cout, ci, k].
    def pack_w(w, ca, ca_p):
        wt = jnp.transpose(w, (0, 2, 1))                     # (C, K, ca)
        wt = jnp.pad(wt, ((0, 0), (0, 0), (0, ca_p - ca)))   # (C, K, ca_p)
        wf = wt.reshape(C, K * ca_p)
        return jnp.pad(wf, ((0, C_p - C), (0, 0))).astype(mxu_dtype)

    w1f = pack_w(w1, Cin, Cin_p)
    w2f = pack_w(w2, C, C_p)
    # All six BN parameters packed into a single (C_p, 6) array -> one tiny DMA.
    pp = jnp.stack([g1, be1, g2, be2, g3, be3], axis=1).astype(jnp.float32)
    pp = jnp.pad(pp, ((0, C_p - C), (0, 0)))

    args = (x2d_p, ident_p, w1f, w2f, pp)
    kernel = functools.partial(_resblock_kernel, N=N, L=L, K=K, pad=pad,
                               eps=eps, mxu_dtype=mxu_dtype)

    out = pl.pallas_call(
        kernel,
        out_shape=jax.ShapeDtypeStruct((C_p, NL), jnp.float32),
        in_specs=[pl.BlockSpec(memory_space=pltpu.MemorySpace.VMEM)] * len(args),
        out_specs=pl.BlockSpec(memory_space=pltpu.MemorySpace.VMEM),
        compiler_params=pltpu.CompilerParams(vmem_limit_bytes=vmem_limit),
    )(*args)

    # (C_p, N*L) -> drop channel padding -> (C, N, L) -> (N, C, L): layout plumbing.
    return out[:C].reshape(C, N, L).transpose(1, 0, 2)


# ------------------------------ pure-JAX reference ------------------------------
def resblock_reference(x, params, *, conv_kernel, conv_pad):
    w1, b1, g1, be1, w2, b2, g2, be2, g3, be3 = params
    eps = 1e-5

    def conv1d(x, w, b):
        y = lax.conv_general_dilated(x, w, (1,), [(conv_pad, conv_pad)],
                                     dimension_numbers=("NCH", "OIH", "NCH"),
                                     precision=lax.Precision.HIGHEST)
        return y + b[None, :, None]

    def bn(x, g, b):
        m = x.mean(axis=(0, 2), keepdims=True)
        v = ((x - m) ** 2).mean(axis=(0, 2), keepdims=True)
        return (x - m) / jnp.sqrt(v + eps) * g[None, :, None] + b[None, :, None]

    h = jax.nn.relu(bn(conv1d(x, w1, b1), g1, be1))
    y = bn(conv1d(h, w2, b2), g2, be2)
    Cin, C = x.shape[1], y.shape[1]
    y = y + (x if C == Cin else jnp.tile(x, (1, C // Cin, 1)))
    return jax.nn.relu(bn(y, g3, be3))


if __name__ == "__main__":
    # config: prev_channel=4, channel=8, conv_kernel=3, stride=1, pad=1
    # L=128 keeps the folded lane axis (N*L = 256) a multiple of 128 (lane-dense).
    N, Cin, C, L, K, pad = 2, 4, 8, 128, 3, 1

    key = jax.random.PRNGKey(0)
    ks = jax.random.split(key, 12)
    x = jax.random.normal(ks[0], (N, Cin, L), jnp.float32)

    params = (
        0.1 * jax.random.normal(ks[1], (C, Cin, K), jnp.float32),   # conv1 weight
        0.1 * jax.random.normal(ks[2], (C,), jnp.float32),          # conv1 bias
        1.0 + 0.1 * jax.random.normal(ks[3], (C,), jnp.float32),    # bn1 gamma
        0.1 * jax.random.normal(ks[4], (C,), jnp.float32),          # bn1 beta
        0.1 * jax.random.normal(ks[5], (C, C, K), jnp.float32),     # conv2 weight
        0.1 * jax.random.normal(ks[6], (C,), jnp.float32),          # conv2 bias
        1.0 + 0.1 * jax.random.normal(ks[7], (C,), jnp.float32),    # bn2 gamma
        0.1 * jax.random.normal(ks[8], (C,), jnp.float32),          # bn2 beta
        1.0 + 0.1 * jax.random.normal(ks[9], (C,), jnp.float32),    # bn3 gamma
        0.1 * jax.random.normal(ks[10], (C,), jnp.float32),         # bn3 beta
    )

    out = resblock_forward(x, params, conv_kernel=K, conv_stride=1, conv_pad=pad)
    out = jax.block_until_ready(out)

    ref = resblock_reference(x, params, conv_kernel=K, conv_pad=pad)
    assert out.shape == (N, C, L)
    # tolerance reflects the intentional bf16 quantization of the MXU inputs
    err = float(jnp.max(jnp.abs(out - ref)))
    assert jnp.allclose(out, ref, atol=2e-2, rtol=2e-2), err
    print("KERNEL_OK")
</pallas_src>

<mosaic_0001>
module attributes {stable_mosaic.version = 11 : i64} {
  func.func @_resblock_kernel(%arg0: memref<8x256xf32, #tpu.memory_space<vmem>>, %arg1: memref<8x256xf32, #tpu.memory_space<vmem>>, %arg2: memref<8x24xbf16, #tpu.memory_space<vmem>>, %arg3: memref<8x24xbf16, #tpu.memory_space<vmem>>, %arg4: memref<8x6xf32, #tpu.memory_space<vmem>>, %arg5: memref<8x256xf32, #tpu.memory_space<vmem>>) attributes {dimension_semantics = [], scalar_prefetch = 0 : i64, scratch_operands = 0 : i64, tpu.core_type = #tpu.core_type<tc>} {
    %0 = tpu.iota {dimensions = array<i32: 1>} : vector<1x256xi32>
    %c128_i32 = arith.constant 128 : i32
    %c0_i32 = arith.constant 0 : i32
    %1 = arith.cmpi eq, %c128_i32, %c0_i32 : i32
    %c1_i32 = arith.constant 1 : i32
    %2 = arith.select %1, %c1_i32, %c128_i32 : i32
    %3 = vector.broadcast %2 : i32 to vector<1x256xi32>
    %4 = arith.remsi %0, %3 : vector<1x256xi32>
    %c0_i32_0 = arith.constant 0 : i32
    %5 = vector.broadcast %c0_i32_0 : i32 to vector<1x256xi32>
    %6 = arith.cmpi ne, %4, %5 : vector<1x256xi32>
    %c0_i32_1 = arith.constant 0 : i32
    %7 = vector.broadcast %c0_i32_1 : i32 to vector<1x256xi32>
    %8 = arith.cmpi slt, %4, %7 : vector<1x256xi32>
    %c0_i32_2 = arith.constant 0 : i32
    %9 = arith.cmpi slt, %2, %c0_i32_2 : i32
    %10 = vector.broadcast %9 : i1 to vector<1x256xi1>
    %11 = vector.broadcast %10 : vector<1x256xi1> to vector<1x256xi1>
    %12 = arith.xori %8, %11 : vector<1x256xi1>
    %13 = arith.andi %12, %6 : vector<1x256xi1>
    %14 = vector.broadcast %2 : i32 to vector<1x256xi32>
    %15 = arith.addi %4, %14 : vector<1x256xi32>
    %16 = arith.select %13, %15, %4 : vector<1x256xi1>, vector<1x256xi32>
    %c-1_i32 = arith.constant -1 : i32
    %17 = vector.broadcast %c-1_i32 : i32 to vector<1x256xi32>
    %18 = arith.addi %16, %17 : vector<1x256xi32>
    %c0_i32_3 = arith.constant 0 : i32
    %19 = vector.broadcast %c0_i32_3 : i32 to vector<1x256xi32>
    %20 = arith.cmpi sge, %18, %19 : vector<1x256xi32>
    %c-1_i32_4 = arith.constant -1 : i32
    %21 = vector.broadcast %c-1_i32_4 : i32 to vector<1x256xi32>
    %22 = arith.addi %16, %21 : vector<1x256xi32>
    %c128_i32_5 = arith.constant 128 : i32
    %23 = vector.broadcast %c128_i32_5 : i32 to vector<1x256xi32>
    %24 = arith.cmpi slt, %22, %23 : vector<1x256xi32>
    %25 = arith.andi %20, %24 : vector<1x256xi1>
    %26 = arith.extui %25 : vector<1x256xi1> to vector<1x256xi32>
    %27 = arith.sitofp %26 : vector<1x256xi32> to vector<1x256xf32>
    %c1_i32_6 = arith.constant 1 : i32
    %28 = vector.broadcast %c1_i32_6 : i32 to vector<1x256xi32>
    %29 = arith.addi %16, %28 : vector<1x256xi32>
    %c0_i32_7 = arith.constant 0 : i32
    %30 = vector.broadcast %c0_i32_7 : i32 to vector<1x256xi32>
    %31 = arith.cmpi sge, %29, %30 : vector<1x256xi32>
    %c1_i32_8 = arith.constant 1 : i32
    %32 = vector.broadcast %c1_i32_8 : i32 to vector<1x256xi32>
    %33 = arith.addi %16, %32 : vector<1x256xi32>
    %c128_i32_9 = arith.constant 128 : i32
    %34 = vector.broadcast %c128_i32_9 : i32 to vector<1x256xi32>
    %35 = arith.cmpi slt, %33, %34 : vector<1x256xi32>
    %36 = arith.andi %31, %35 : vector<1x256xi1>
    %37 = arith.extui %36 : vector<1x256xi1> to vector<1x256xi32>
    %38 = arith.sitofp %37 : vector<1x256xi32> to vector<1x256xf32>
    %c0 = arith.constant 0 : index
    %c0_10 = arith.constant 0 : index
    %39 = vector.load %arg0[%c0, %c0_10] : memref<8x256xf32, #tpu.memory_space<vmem>>, vector<8x256xf32>
    %c0_11 = arith.constant 0 : index
    %c0_12 = arith.constant 0 : index
    %40 = vector.load %arg2[%c0_11, %c0_12] : memref<8x24xbf16, #tpu.memory_space<vmem>>, vector<8x24xbf16>
    %c1_i32_13 = arith.constant 1 : i32
    %41 = tpu.dynamic_rotate %39 by %c1_i32_13 dim 1 : vector<8x256xf32>, i32 -> vector<8x256xf32>
    %42 = vector.broadcast %27 : vector<1x256xf32> to vector<8x256xf32>
    %43 = arith.mulf %41, %42 : vector<8x256xf32>
    %c255_i32 = arith.constant 255 : i32
    %44 = tpu.dynamic_rotate %39 by %c255_i32 dim 1 : vector<8x256xf32>, i32 -> vector<8x256xf32>
    %45 = vector.broadcast %38 : vector<1x256xf32> to vector<8x256xf32>
    %46 = arith.mulf %44, %45 : vector<8x256xf32>
    %47 = tpu.concatenate %43, %39, %46 in 0 : vector<8x256xf32>, vector<8x256xf32>, vector<8x256xf32> -> vector<24x256xf32>
    %48 = arith.truncf %47 : vector<24x256xf32> to vector<24x256xbf16>
    %cst = arith.constant dense<0.000000e+00> : vector<8x256xf32>
    %49 = tpu.matmul %40, %48, %cst {dimension_numbers = #tpu.dot_dimension_numbers<[1], [0], [0], [1], [0, 0, 1, 1], [], []>} : vector<8x24xbf16>, vector<24x256xbf16>, vector<8x256xf32> -> vector<8x256xf32>
    %c0_14 = arith.constant 0 : index
    %c0_15 = arith.constant 0 : index
    %50 = vector.load %arg4[%c0_14, %c0_15] : memref<8x6xf32, #tpu.memory_space<vmem>>, vector<8x1xf32>
    %c0_16 = arith.constant 0 : index
    %c1 = arith.constant 1 : index
    %51 = vector.load %arg4[%c0_16, %c1] : memref<8x6xf32, #tpu.memory_space<vmem>>, vector<8x1xf32>
    %cst_17 = arith.constant dense<0.000000e+00> : vector<8xf32>
    %52 = vector.multi_reduction <add>, %49, %cst_17 [1] : vector<8x256xf32> to vector<8xf32>
    %53 = vector.shape_cast %52 : vector<8xf32> to vector<8x1xf32>
    %cst_18 = arith.constant 3.906250e-03 : f32
    %54 = vector.broadcast %cst_18 : f32 to vector<8x1xf32>
    %55 = arith.mulf %53, %54 : vector<8x1xf32>
    %56 = vector.broadcast %55 : vector<8x1xf32> to vector<8x256xf32>
    %57 = arith.subf %49, %56 : vector<8x256xf32>
    %58 = arith.mulf %57, %57 : vector<8x256xf32>
    %cst_19 = arith.constant dense<0.000000e+00> : vector<8xf32>
    %59 = vector.multi_reduction <add>, %58, %cst_19 [1] : vector<8x256xf32> to vector<8xf32>
    %60 = vector.shape_cast %59 : vector<8xf32> to vector<8x1xf32>
    %cst_20 = arith.constant 3.906250e-03 : f32
    %61 = vector.broadcast %cst_20 : f32 to vector<8x1xf32>
    %62 = arith.mulf %60, %61 : vector<8x1xf32>
    %cst_21 = arith.constant 9.99999974E-6 : f32
    %63 = vector.broadcast %cst_21 : f32 to vector<8x1xf32>
    %64 = arith.addf %62, %63 : vector<8x1xf32>
    %65 = math.rsqrt %64 : vector<8x1xf32>
    %66 = arith.mulf %50, %65 : vector<8x1xf32>
    %67 = vector.broadcast %66 : vector<8x1xf32> to vector<8x256xf32>
    %68 = arith.mulf %57, %67 : vector<8x256xf32>
    %69 = vector.broadcast %51 : vector<8x1xf32> to vector<8x256xf32>
    %70 = arith.addf %68, %69 : vector<8x256xf32>
    %cst_22 = arith.constant 0.000000e+00 : f32
    %71 = vector.broadcast %cst_22 : f32 to vector<8x256xf32>
    %72 = arith.maximumf %70, %71 : vector<8x256xf32>
    %c0_23 = arith.constant 0 : index
    %c0_24 = arith.constant 0 : index
    %73 = vector.load %arg3[%c0_23, %c0_24] : memref<8x24xbf16, #tpu.memory_space<vmem>>, vector<8x24xbf16>
    %c1_i32_25 = arith.constant 1 : i32
    %74 = tpu.dynamic_rotate %72 by %c1_i32_25 dim 1 : vector<8x256xf32>, i32 -> vector<8x256xf32>
    %75 = vector.broadcast %27 : vector<1x256xf32> to vector<8x256xf32>
    %76 = arith.mulf %74, %75 : vector<8x256xf32>
    %c255_i32_26 = arith.constant 255 : i32
    %77 = tpu.dynamic_rotate %72 by %c255_i32_26 dim 1 : vector<8x256xf32>, i32 -> vector<8x256xf32>
    %78 = vector.broadcast %38 : vector<1x256xf32> to vector<8x256xf32>
    %79 = arith.mulf %77, %78 : vector<8x256xf32>
    %80 = tpu.concatenate %76, %72, %79 in 0 : vector<8x256xf32>, vector<8x256xf32>, vector<8x256xf32> -> vector<24x256xf32>
    %81 = arith.truncf %80 : vector<24x256xf32> to vector<24x256xbf16>
    %cst_27 = arith.constant dense<0.000000e+00> : vector<8x256xf32>
    %82 = tpu.matmul %73, %81, %cst_27 {dimension_numbers = #tpu.dot_dimension_numbers<[1], [0], [0], [1], [0, 0, 1, 1], [], []>} : vector<8x24xbf16>, vector<24x256xbf16>, vector<8x256xf32> -> vector<8x256xf32>
    %c0_28 = arith.constant 0 : index
    %c2 = arith.constant 2 : index
    %83 = vector.load %arg4[%c0_28, %c2] : memref<8x6xf32, #tpu.memory_space<vmem>>, vector<8x1xf32>
    %c0_29 = arith.constant 0 : index
    %c3 = arith.constant 3 : index
    %84 = vector.load %arg4[%c0_29, %c3] : memref<8x6xf32, #tpu.memory_space<vmem>>, vector<8x1xf32>
    %cst_30 = arith.constant dense<0.000000e+00> : vector<8xf32>
    %85 = vector.multi_reduction <add>, %82, %cst_30 [1] : vector<8x256xf32> to vector<8xf32>
    %86 = vector.shape_cast %85 : vector<8xf32> to vector<8x1xf32>
    %cst_31 = arith.constant 3.906250e-03 : f32
    %87 = vector.broadcast %cst_31 : f32 to vector<8x1xf32>
    %88 = arith.mulf %86, %87 : vector<8x1xf32>
    %89 = vector.broadcast %88 : vector<8x1xf32> to vector<8x256xf32>
    %90 = arith.subf %82, %89 : vector<8x256xf32>
    %91 = arith.mulf %90, %90 : vector<8x256xf32>
    %cst_32 = arith.constant dense<0.000000e+00> : vector<8xf32>
    %92 = vector.multi_reduction <add>, %91, %cst_32 [1] : vector<8x256xf32> to vector<8xf32>
    %93 = vector.shape_cast %92 : vector<8xf32> to vector<8x1xf32>
    %cst_33 = arith.constant 3.906250e-03 : f32
    %94 = vector.broadcast %cst_33 : f32 to vector<8x1xf32>
    %95 = arith.mulf %93, %94 : vector<8x1xf32>
    %cst_34 = arith.constant 9.99999974E-6 : f32
    %96 = vector.broadcast %cst_34 : f32 to vector<8x1xf32>
    %97 = arith.addf %95, %96 : vector<8x1xf32>
    %98 = math.rsqrt %97 : vector<8x1xf32>
    %99 = arith.mulf %83, %98 : vector<8x1xf32>
    %100 = vector.broadcast %99 : vector<8x1xf32> to vector<8x256xf32>
    %101 = arith.mulf %90, %100 : vector<8x256xf32>
    %102 = vector.broadcast %84 : vector<8x1xf32> to vector<8x256xf32>
    %103 = arith.addf %101, %102 : vector<8x256xf32>
    %c0_35 = arith.constant 0 : index
    %c0_36 = arith.constant 0 : index
    %104 = vector.load %arg1[%c0_35, %c0_36] : memref<8x256xf32, #tpu.memory_space<vmem>>, vector<8x256xf32>
    %105 = arith.addf %103, %104 : vector<8x256xf32>
    %c0_37 = arith.constant 0 : index
    %c4 = arith.constant 4 : index
    %106 = vector.load %arg4[%c0_37, %c4] : memref<8x6xf32, #tpu.memory_space<vmem>>, vector<8x1xf32>
    %c0_38 = arith.constant 0 : index
    %c5 = arith.constant 5 : index
    %107 = vector.load %arg4[%c0_38, %c5] : memref<8x6xf32, #tpu.memory_space<vmem>>, vector<8x1xf32>
    %cst_39 = arith.constant dense<0.000000e+00> : vector<8xf32>
    %108 = vector.multi_reduction <add>, %105, %cst_39 [1] : vector<8x256xf32> to vector<8xf32>
    %109 = vector.shape_cast %108 : vector<8xf32> to vector<8x1xf32>
    %cst_40 = arith.constant 3.906250e-03 : f32
    %110 = vector.broadcast %cst_40 : f32 to vector<8x1xf32>
    %111 = arith.mulf %109, %110 : vector<8x1xf32>
    %112 = vector.broadcast %111 : vector<8x1xf32> to vector<8x256xf32>
    %113 = arith.subf %105, %112 : vector<8x256xf32>
    %114 = arith.mulf %113, %113 : vector<8x256xf32>
    %cst_41 = arith.constant dense<0.000000e+00> : vector<8xf32>
    %115 = vector.multi_reduction <add>, %114, %cst_41 [1] : vector<8x256xf32> to vector<8xf32>
    %116 = vector.shape_cast %115 : vector<8xf32> to vector<8x1xf32>
    %cst_42 = arith.constant 3.906250e-03 : f32
    %117 = vector.broadcast %cst_42 : f32 to vector<8x1xf32>
    %118 = arith.mulf %116, %117 : vector<8x1xf32>
    %cst_43 = arith.constant 9.99999974E-6 : f32
    %119 = vector.broadcast %cst_43 : f32 to vector<8x1xf32>
    %120 = arith.addf %118, %119 : vector<8x1xf32>
    %121 = math.rsqrt %120 : vector<8x1xf32>
    %122 = arith.mulf %106, %121 : vector<8x1xf32>
    %123 = vector.broadcast %122 : vector<8x1xf32> to vector<8x256xf32>
    %124 = arith.mulf %113, %123 : vector<8x256xf32>
    %125 = vector.broadcast %107 : vector<8x1xf32> to vector<8x256xf32>
    %126 = arith.addf %124, %125 : vector<8x256xf32>
    %cst_44 = arith.constant 0.000000e+00 : f32
    %127 = vector.broadcast %cst_44 : f32 to vector<8x256xf32>
    %128 = arith.maximumf %126, %127 : vector<8x256xf32>
    %c0_45 = arith.constant 0 : index
    %c0_46 = arith.constant 0 : index
    %129 = vector.load %arg5[%c0_45, %c0_46] : memref<8x256xf32, #tpu.memory_space<vmem>>, vector<8x256xf32>
    tpu.vector_store %arg5[%c0_45, %c0_46], %128 {strides = array<i32>} : memref<8x256xf32, #tpu.memory_space<vmem>>, vector<8x256xf32>,
    return
  }
}

</mosaic_0001>

<bundles_post_ra>
// kernel: tpu_custom_call.1
= control target key start
LH: loop header
LB: loop body
LE: loop exit
PB: predicated region body
PF: predicated region fallthrough
CT: control target
= control target key end

     0   :  { %10 = vsyncpa [#allocation3], 0  ;;  %s654_s0 = inlined_call_operand.hbm [shape: f32[8,256], index: 0, kind: input, shape index: {}]   ;;  %s655_s1 = inlined_call_operand.hbm [shape: f32[8,256], index: 1, kind: input, shape index: {}]   ;;  %s656_s2 = inlined_call_operand.vmem [shape: bf16[8,24], index: 2, kind: input, shape index: {}]   ;;  %s657_s3 = inlined_call_operand.hbm [shape: bf16[8,24], index: 3, kind: input, shape index: {}]   ;;  %s658_s4 = inlined_call_operand.vmem [shape: f32[8,6], index: 4, kind: input, shape index: {}]   ;;  %s659_s5 = inlined_call_operand.hbm [shape: f32[8,256], index: 5, kind: output, shape index: {}]  }
   0x1   :  { %11 = vsyncpa [#allocation6], 0 }
   0x2   :  { %12 = vsyncpa [#allocation4], 0  ;;  %s496_s18 = smov [#allocation5]   ;;  %s497_s20 = smov [#allocation2]  }
   0x3   :  { %s29_s19 = sshll.u32 %s496_s18, 4  ;;  %s19_s21 = sshll.u32 %s497_s20, 4  ;;  %s30_s19 = int_to_ptr.vmem [resolvable:$true] %s29_s19  ;;  %s20_s21 = int_to_ptr.vmem [resolvable:$true] %s19_s21 }
   0x4   :  { %s402_s24 = scalar_lea.hbm %s655_s1, 256 }
   0x5   :  { %p403_p0 = scmp.ne.s32.totalorder %s655_s1, %s402_s24  ;;  %p406_p1 = scmp.lt.u32.totalorder %s402_s24, %s655_s1 }
   0x7   :  { %p408_p2 = pnand %p406_p1, %p403_p0 }
   0x9   :  { %411 = shalt.err (!%p408_p2)
}
   0xa   :  { %s412_s29 = scalar_lea.vmem %s30_s19, 256  ;;  %p417_p4 = scmp.lt.s32.totalorder %s30_s19, %s30_s19 }
   0xb   :  { %p413_p3 = scmp.ne.s32.totalorder %s30_s19, %s412_s29  ;;  %p418_p5 = scmp.lt.s32.totalorder %s412_s29, %s412_s29 }
   0xd   :  { %p419_p6 = por %p418_p5, %p417_p4 }
   0xf   :  { %p420_p7 = pnand %p419_p6, %p413_p3 }
  0x11   :  { %423 = shalt.err (!%p420_p7)
}
  0x12   :  { %32 = dma.hbm_to_vmem [thread:$0]  %s655_s1, 256, %s30_s19, [#allocation6]  }
  0x13   :  { %s424_s9 = scalar_lea.hbm %s654_s0, 256 }
  0x14   :  { %p425_p8 = scmp.ne.s32.totalorder %s654_s0, %s424_s9  ;;  %p428_p9 = scmp.lt.u32.totalorder %s424_s9, %s654_s0 }
  0x16   :  { %p430_p10 = pnand %p428_p9, %p425_p8 }
  0x18   :  { %433 = shalt.err (!%p430_p10)
}
  0x19   :  { %s434_s14 = scalar_lea.vmem %s20_s21, 256  ;;  %p439_p12 = scmp.lt.s32.totalorder %s20_s21, %s20_s21 }
  0x1a   :  { %p435_p11 = scmp.ne.s32.totalorder %s20_s21, %s434_s14  ;;  %p440_p13 = scmp.lt.s32.totalorder %s434_s14, %s434_s14 }
  0x1c   :  { %p441_p0 = por %p440_p13, %p439_p12 }
  0x1e   :  { %p442_p1 = pnand %p441_p0, %p435_p11 }
  0x20   :  { %445 = shalt.err (!%p442_p1)
}
  0x21   :  { %22 = dma.hbm_to_vmem [thread:$0]  %s654_s0, 256, %s20_s21, [#allocation3]  }
  0x22   :  { %s498_s16 = smov [#allocation7]   ;;  %s446_s20 = scalar_lea.hbm %s657_s3, 64 }
  0x23   :  { %s41_s17 = sshll.u32 %s498_s16, 4  ;;  %p447_p2 = scmp.ne.s32.totalorder %s657_s3, %s446_s20  ;;  %s42_s17 = int_to_ptr.vmem [resolvable:$true] %s41_s17 }
  0x24   :  { %p450_p3 = scmp.lt.u32.totalorder %s446_s20, %s657_s3 }
  0x26   :  { %p452_p4 = pnand %p450_p3, %p447_p2 }
  0x28   :  { %455 = shalt.err (!%p452_p4)
}
  0x29   :  { %s456_s26 = scalar_lea.vmem %s42_s17, 64  ;;  %p461_p6 = scmp.lt.s32.totalorder %s42_s17, %s42_s17 }
  0x2a   :  { %p457_p5 = scmp.ne.s32.totalorder %s42_s17, %s456_s26  ;;  %p462_p7 = scmp.lt.s32.totalorder %s456_s26, %s456_s26 }
  0x2c   :  { %p463_p8 = por %p462_p7, %p461_p6 }
  0x2e   :  { %p464_p9 = pnand %p463_p8, %p457_p5 }
  0x30   :  { %467 = shalt.err (!%p464_p9)
}
  0x31   :  { %44 = dma.hbm_to_vmem [thread:$0]  %s657_s3, 64, %s42_s17, [#allocation6]  }
  0x32   :  { %490 = dma.done.wait [#allocation3], 256  }
  0x33   :  { %491 = vsyncadd [#allocation3], 4294967040 }
  0x34   :  { %492 = dma.done.wait [#allocation6], 320  }
  0x35   :  { %493 = vsyncadd [#allocation6], 4294966976  ;;  %v108_v0 = vld [vmem:[#allocation2] sm:$0xff]  ;;  %s499_s27 = smov 127   ;;  %s500_s28 = smov 1   ;;  %v109_v1 = vld [vmem:[#allocation2 + $0x8] sm:$0xff]  ;;  %v57_v3 = vlaneseq }
  0x36   :  { %120 = vrot.lane.b32.xlu1 %v108_v0, %s499_s27  ;;  %111 = vrot.lane.b32.xlu0 %v108_v0, %s500_s28  ;;  %v501_v2 = vmov 0   ;;  %v502_v13 = vmov 0.0   ;;  %vm137_vm6 = vcmask 1043456   ;;  %v110_v33 = vld [vmem:[%s656_s2] sm:$0xf]  ;;  %vm133_vm7 = vcmask 195584  }
  0x37   :  { %176 = vmatprep.mubr.bf16.mxu0 %v501_v2  ;;  %389 = vset.pattern.permute.xlu0 %v501_v2  ;;  %v579_v4 = vand.u32 127, %v57_v3  ;;  %v615_v46 = vld [vmem:[%s658_s4] sm:$0xff]  ;;  %v503_v47 = vmov 1   ;;  %s508_s2 = smov [#allocation8]  }
  0x38   :  { %279 = vmatprep.mubr.bf16.mxu1 %v501_v2  ;;  %390 = vset.pattern.permute.xlu1 %v503_v47  ;;  %s358_s4 = sshll.u32 %s508_s2, 4  ;;  %s359_s4 = int_to_ptr.vmem [resolvable:$true] %s358_s4 }
  0x39   :  { %v59_v5 = vadd.s32 128, %v579_v4  ;;  %v96_v7 = vadd.s32 1, %v579_v4  ;;  %v84_v9 = vadd.s32 4294967295, %v579_v4  ;;  %vm124_vm4 = vcmp.lt.s32.totalorder %v579_v4, 127  ;;  %s468_s7 = scalar_lea.vmem %s359_s4, 256  ;;  %p473_p11 = scmp.lt.s32.totalorder %s359_s4, %s359_s4 }
  0x3a   :  { %122 = vrot.lane.b32.xlu1 %v109_v1, %s499_s27  ;;  %113 = vrot.lane.b32.xlu0 %v109_v1, %s500_s28  ;;  %vm115_vm5 = vcmp.lt.s32.totalorder %v579_v4, 1  ;;  %p469_p10 = scmp.ne.s32.totalorder %s359_s4, %s468_s7  ;;  %p474_p12 = scmp.lt.s32.totalorder %s468_s7, %s468_s7 }
  0x3b   :  { %v71_v6 = vand.u32 127, %v59_v5  ;;  %vm100_vm0 = vcmp.lt.s32.totalorder %v96_v7, 128  ;;  %vm86_vm2 = vcmp.ge.s32.totalorder %v84_v9, 0 }
  0x3c   :  { %v586_v14 = vsel %vm100_vm0, 1.0, %v502_v13  ;;  %v590_v16 = vsel %vm86_vm2, 1.0, %v502_v13  ;;  %p475_p13 = por %p474_p12, %p473_p11 }
  0x3d   :  { %v97_v8 = vadd.s32 1, %v71_v6  ;;  %v85_v10 = vadd.s32 4294967295, %v71_v6 }
  0x3e   :  { %p476_p0 = pnand %p475_p13, %p469_p10 }
  0x3f   :  { %vm101_vm1 = vcmp.lt.s32.totalorder %v97_v8, 128  ;;  %vm87_vm3 = vcmp.ge.s32.totalorder %v85_v10, 0 }
  0x40   :  { %v588_v15 = vsel %vm101_vm1, 1.0, %v502_v13  ;;  %v592_v17 = vsel %vm87_vm3, 1.0, %v502_v13 }
  0xa8   :  { %v121_v11 = vpop.permute.xlu1 %120  ;;  %v112_v12 = vpop.permute.xlu0 %111 }
  0xac   :  { %v123_v18 = vpop.permute.xlu1 %122  ;;  %v114_v19 = vpop.permute.xlu0 %113 }
  0xad   :  { %v125_v20 = vsel %vm124_vm4, %v121_v11, %v123_v18  ;;  %v126_v21 = vsel %vm124_vm4, %v123_v18, %v121_v11  ;;  %v116_v22 = vsel %vm115_vm5, %v112_v12, %v114_v19  ;;  %v117_v23 = vsel %vm115_vm5, %v114_v19, %v112_v12 }
  0xae   :  { %v127_v24 = vmul.f32 %v586_v14, %v125_v20  ;;  %v128_v25 = vmul.f32 %v588_v15, %v126_v21  ;;  %v118_v26 = vmul.f32 %v590_v16, %v117_v23  ;;  %v119_v27 = vmul.f32 %v592_v17, %v116_v22 }
  0xb0   :  { %v130_v28 = vpack.c.bf16 %v109_v1, %v119_v27  ;;  %v129_v29 = vpack.c.bf16 %v108_v0, %v118_v26  ;;  %v131_v30 = vpack.c.bf16 %v127_v24, %v127_v24  ;;  %v132_v31 = vpack.c.bf16 %v128_v25, %v128_v25 }
  0xb1   :  { %v504_v27 = vmov 2  }
  0xb2   :  { %144 = vmatprep.subr.bf16.mxu0 %v130_v28  ;;  %v139_v32 = vsel %vm137_vm6, %v131_v30, 0  ;;  %v505_v28 = vmov 3  }
  0xb3   :  { %145 = vmatpush1.bf16.msra.mxu0 %v129_v29 }
  0xb4   :  { %372 = vmatprep.subr.msk.bf16.mxu0 %vm137_vm6, %v132_v31 }
  0xb7   :  { %147 = vmatpush1.bf16.msra.mxu0 %v139_v32 }
  0xba   :  { %373 = vmatmul.mubr.msk.bf16.vlgmr.msra.gmra.mrb[0].mxu0 %vm133_vm7, %v110_v33 }
 0x18d   :  { %v178_v34 = vpop.f32.mrb[0].mxu0 }
 0x18e   :  { %v180_v35 = vpop.f32.mrb[1].mxu0 }
 0x18f   :  { %v182_v36 = vpop.f32.mrb[2].mxu0  ;;  %v186_v37 = vadd.f32 %v180_v35, %v178_v34 }
 0x190   :  { %v183_v38 = vpop.f32.mrb[3].mxu0 }
 0x191   :  { %187 = vadd.xlane.f32.xlu0 %v186_v37  ;;  %v316_v38 = vld [vmem:[#allocation5] sm:$0xff] }
 0x21e   :  { %v188_v39 = vpop.xlane.xlu0 %187 }
 0x21f   :  { %v189_v40 = vmul.f32 0.00390625, %v188_v39  ;;  %v317_v39 = vld [vmem:[#allocation5 + $0x8] sm:$0xff] }
 0x221   :  { %v190_v41 = vsub.f32 %v178_v34, %v189_v40  ;;  %v191_v42 = vsub.f32 %v180_v35, %v189_v40 }
 0x223   :  { %v192_v43 = vmul.f32 %v190_v41, %v190_v41  ;;  %v193_v44 = vmul.f32 %v191_v42, %v191_v42 }
 0x225   :  { %v194_v45 = vadd.f32 %v193_v44, %v192_v43 }
 0x227   :  { %195 = vadd.xlane.f32.xlu1 %v194_v45 }
 0x238   :  { %210 = vperm.xlu1 %390, %v615_v46  }
 0x23c   :  { %391 = vset.pattern.permute.xlu1 %v504_v27 }
 0x2b4   :  { %v196_v48 = vpop.xlane.xlu1 %195 }
 0x2b5   :  { %v197_v49 = vmul.f32 0.00390625, %v196_v48 }
 0x2b7   :  { %v198_v50 = vadd.f32 1e-05, %v197_v49 }
 0x2b8   :  { %v211_v54 = vpop.permute.xlu1 %210 }
 0x2b9   :  { %396 = vrsqrt.f32 %v198_v50 }
 0x2c3   :  { %v397_v51 = vpop.eup %396 }
 0x2c4   :  { %v200_v52 = vmul.f32 %v397_v51, %v615_v46 }
 0x2c6   :  { %203 = vperm.xlu0 %389, %v200_v52  }
 0x2ca   :  { %392 = vset.pattern.permute.xlu0 %v505_v28 }
 0x345   :  { %v204_v53 = vpop.permute.xlu0 %203 }
 0x346   :  { %v206_v55 = vmul.f32 %v204_v53, %v190_v41  ;;  %v207_v56 = vmul.f32 %v204_v53, %v191_v42  ;;  %v506_v53 = vmov 4  }
 0x348   :  { %v213_v57 = vadd.f32 %v211_v54, %v206_v55  ;;  %v214_v58 = vadd.f32 %v211_v54, %v207_v56  ;;  %v507_v54 = vmov 5  }
 0x34a   :  { %v215_v59 = vmax.f32 %v213_v57, 0.0  ;;  %v216_v60 = vmax.f32 %v214_v58, 0.0 }
 0x34c   :  { %218 = vrot.lane.b32.xlu1 %v215_v59, %s500_s28 }
 0x350   :  { %220 = vrot.lane.b32.xlu1 %v216_v60, %s500_s28 }
 0x354   :  { %226 = vrot.lane.b32.xlu1 %v215_v59, %s499_s27 }
 0x358   :  { %228 = vrot.lane.b32.xlu1 %v216_v60, %s499_s27 }
 0x3be   :  { %v219_v61 = vpop.permute.xlu1 %218 }
 0x3c2   :  { %v221_v62 = vpop.permute.xlu1 %220 }
 0x3c3   :  { %v222_v63 = vsel %vm115_vm5, %v219_v61, %v221_v62  ;;  %v223_v0 = vsel %vm115_vm5, %v221_v62, %v219_v61 }
 0x3c4   :  { %v224_v1 = vmul.f32 %v590_v16, %v223_v0  ;;  %v225_v2 = vmul.f32 %v592_v17, %v222_v63  ;;  %v217_v17 = vld [vmem:[#allocation7] sm:$0xf] }
 0x3c6   :  { %v227_v3 = vpop.permute.xlu1 %226  ;;  %v235_v5 = vpack.c.bf16 %v216_v60, %v225_v2  ;;  %v234_v6 = vpack.c.bf16 %v215_v59, %v224_v1 }
 0x3c8   :  { %247 = vmatprep.subr.bf16.mxu1 %v235_v5 }
 0x3c9   :  { %248 = vmatpush1.bf16.msra.mxu1 %v234_v6 }
 0x3ca   :  { %v229_v7 = vpop.permute.xlu1 %228 }
 0x3cb   :  { %v230_v8 = vsel %vm124_vm4, %v227_v3, %v229_v7  ;;  %v231_v9 = vsel %vm124_vm4, %v229_v7, %v227_v3 }
 0x3cc   :  { %v232_v10 = vmul.f32 %v586_v14, %v230_v8  ;;  %v233_v11 = vmul.f32 %v588_v15, %v231_v9 }
 0x3ce   :  { %v236_v12 = vpack.c.bf16 %v232_v10, %v232_v10  ;;  %v237_v13 = vpack.c.bf16 %v233_v11, %v233_v11 }
 0x3d0   :  { %374 = vmatprep.subr.msk.bf16.mxu1 %vm137_vm6, %v237_v13  ;;  %v242_v16 = vsel %vm137_vm6, %v236_v12, 0 }
 0x3d1   :  { %250 = vmatpush1.bf16.msra.mxu1 %v242_v16 }
 0x3d4   :  { %375 = vmatmul.mubr.msk.bf16.vlgmr.msra.gmra.mrb[0].mxu1 %vm133_vm7, %v217_v17 }
 0x4a7   :  { %v281_v18 = vpop.f32.mrb[0].mxu1 }
 0x4a8   :  { %v283_v19 = vpop.f32.mrb[1].mxu1 }
 0x4a9   :  { %v285_v20 = vpop.f32.mrb[2].mxu1  ;;  %v288_v21 = vadd.f32 %v283_v19, %v281_v18 }
 0x4aa   :  { %v286_v4 = vpop.f32.mrb[3].mxu1 }
 0x4ab   :  { %289 = vadd.xlane.f32.xlu1 %v288_v21 }
 0x538   :  { %v290_v22 = vpop.xlane.xlu1 %289 }
 0x539   :  { %v291_v14 = vmul.f32 0.00390625, %v290_v22 }
 0x53b   :  { %v292_v23 = vsub.f32 %v281_v18, %v291_v14  ;;  %v293_v15 = vsub.f32 %v283_v19, %v291_v14 }
 0x53d   :  { %v294_v24 = vmul.f32 %v292_v23, %v292_v23  ;;  %v295_v25 = vmul.f32 %v293_v15, %v293_v15 }
 0x53f   :  { %v296_v26 = vadd.f32 %v295_v25, %v294_v24 }
 0x541   :  { %297 = vadd.xlane.f32.xlu0 %v296_v26 }
 0x557   :  { %311 = vperm.xlu0 %392, %v615_v46  }
 0x55b   :  { %395 = vset.pattern.permute.xlu0 %v507_v54 }
 0x5ce   :  { %v298_v29 = vpop.xlane.xlu0 %297 }
 0x5cf   :  { %v299_v30 = vmul.f32 0.00390625, %v298_v29 }
 0x5d1   :  { %v300_v31 = vadd.f32 1e-05, %v299_v30 }
 0x5d3   :  { %398 = vrsqrt.f32 %v300_v31 }
 0x5d6   :  { %v312_v35 = vpop.permute.xlu0 %311 }
 0x5dd   :  { %v399_v32 = vpop.eup %398 }
 0x5de   :  { %v302_v33 = vmul.f32 %v399_v32, %v615_v46 }
 0x5e0   :  { %305 = vperm.xlu1 %391, %v302_v33  }
 0x5e4   :  { %393 = vset.pattern.permute.xlu1 %v506_v53 }
 0x65f   :  { %v306_v34 = vpop.permute.xlu1 %305 }
 0x660   :  { %v308_v36 = vmul.f32 %v306_v34, %v292_v23  ;;  %v309_v37 = vmul.f32 %v306_v34, %v293_v15 }
 0x662   :  { %v314_v40 = vadd.f32 %v312_v35, %v308_v36  ;;  %v315_v41 = vadd.f32 %v312_v35, %v309_v37 }
 0x664   :  { %v318_v42 = vadd.f32 %v316_v38, %v314_v40  ;;  %v319_v43 = vadd.f32 %v317_v39, %v315_v41 }
 0x666   :  { %v320_v44 = vadd.f32 %v319_v43, %v318_v42 }
 0x668   :  { %321 = vadd.xlane.f32.xlu1 %v320_v44 }
 0x6f5   :  { %v322_v45 = vpop.xlane.xlu1 %321 }
 0x6f6   :  { %v323_v47 = vmul.f32 0.00390625, %v322_v45 }
 0x6f8   :  { %v324_v48 = vsub.f32 %v318_v42, %v323_v47  ;;  %v325_v49 = vsub.f32 %v319_v43, %v323_v47 }
 0x6fa   :  { %v326_v50 = vmul.f32 %v324_v48, %v324_v48  ;;  %v327_v51 = vmul.f32 %v325_v49, %v325_v49 }
 0x6fc   :  { %v328_v52 = vadd.f32 %v327_v51, %v326_v50 }
 0x6fe   :  { %329 = vadd.xlane.f32.xlu0 %v328_v52 }
 0x78b   :  { %v330_v55 = vpop.xlane.xlu0 %329 }
 0x78c   :  { %v331_v56 = vmul.f32 0.00390625, %v330_v55 }
 0x78e   :  { %v332_v57 = vadd.f32 1e-05, %v331_v56 }
 0x790   :  { %400 = vrsqrt.f32 %v332_v57 }
 0x79a   :  { %v401_v58 = vpop.eup %400 }
 0x79b   :  { %v334_v59 = vmul.f32 %v401_v58, %v615_v46 }
 0x79d   :  { %337 = vperm.xlu1 %393, %v334_v59  }
 0x7a1   :  { %394 = vset.pattern.permute.xlu1 %v507_v54 }
 0x7a2   :  { %343 = vperm.xlu1 %394, %v615_v46  }
 0x81c   :  { %v338_v60 = vpop.permute.xlu1 %337 }
 0x81d   :  { %v340_v61 = vmul.f32 %v338_v60, %v324_v48  ;;  %v341_v62 = vmul.f32 %v338_v60, %v325_v49 }
 0x821   :  { %v344_v63 = vpop.permute.xlu1 %343 }
 0x822   :  { %v346_v0 = vadd.f32 %v344_v63, %v340_v61  ;;  %v347_v1 = vadd.f32 %v344_v63, %v341_v62 }
 0x824   :  { %v348_v2 = vmax.f32 %v346_v0, 0.0  ;;  %v349_v3 = vmax.f32 %v347_v1, 0.0 }
 0x826   :  { %350 = vst [vmem:[#allocation8] sm:$0xff] %v348_v2  ;;  %351 = vst [vmem:[#allocation8 + $0x8] sm:$0xff] %v349_v3 }
 0x827   :  { %479 = shalt.err (!%p476_p0)
}
 0x828   :  { %s480_s10 = scalar_lea.hbm %s659_s5, 256 }
 0x829   :  { %p481_p1 = scmp.ne.s32.totalorder %s659_s5, %s480_s10  ;;  %p484_p2 = scmp.lt.u32.totalorder %s480_s10, %s659_s5 }
 0x82b   :  { %p486_p3 = pnand %p484_p2, %p481_p1 }
 0x82d   :  { %489 = shalt.err (!%p486_p3)
}
 0x82e   :  { %361 = dma.vmem_to_hbm [thread:$0]  %s359_s4, 256, %s659_s5, [#allocation4]  }
 0x82f   :  { %494 = dma.done.wait [#allocation4], 256  }
 0x830   :  { %495 = vsyncadd [#allocation4], 4294967040 }
 0x831   :  { %365 = vsyncpa [#allocation3], 1 }
 0x832   :  { %366 = vsyncpa [#allocation6], 1 }
 0x833   :  { %367 = vsyncpa [#allocation4], 1 }

</bundles_post_ra>
